<compile_context>
chip_gen: v5e
topology: v5e:2x2
jax: 0.10.0
libtpu: 0.0.40
codegen_flags: <defaults>
</compile_context>

<pallas_src>
import jax
import jax.numpy as jnp
from jax.experimental import pallas as pl
from jax.experimental.pallas import tpu as pltpu


STATE_DIM = 4      # DroneEnv observation_space.shape[0]
ACTION_DIM = 2     # DroneEnv action_space.shape[0]
HIDDEN = 256
MAX_ACTION = 1.0   # float(env.action_space.high[0])  (unused in forward())

MISC_ROWS = 8      # resident f32 slab: row0=b1, row1=b2, row2=head bias (padded),
W1_ROW = 4         #                    rows 4..4+STATE_DIM-1 = w1


def _round_up(x, m):
    return (x + m - 1) // m * m


def actor_fwd_kernel(s_ref, misc_ref, w2_ref, wh_ref, mean_ref, std_ref):
    x = s_ref[...]                                        # (TB, STATE_DIM) f32

    # ---- layer 1: relu(state @ W1 + b1) on the VPU (K=4; MXU kept free) ----
    h1 = x[:, 0:1] * misc_ref[W1_ROW:W1_ROW + 1, :] + misc_ref[0:1, :]
    for k in range(1, STATE_DIM):                         # unrolled broadcast-FMAs
        h1 = h1 + x[:, k:k + 1] * misc_ref[W1_ROW + k:W1_ROW + k + 1, :]
    h1 = jnp.maximum(h1, 0.0)                             # (TB, HIDDEN) f32

    # ---- layer 2: the big MXU matmul (256x256), f32 accumulation ----
    w2 = w2_ref[...]
    h2 = jnp.dot(h1.astype(w2.dtype), w2,
                 preferred_element_type=jnp.float32) + misc_ref[1:2, :]
    h2 = jnp.maximum(h2, 0.0)                             # (TB, HIDDEN) f32

    # ---- fused heads: one (HIDDEN, 2*ACTION_DIM) matmul for mean & log_std ----
    wh = wh_ref[...]
    head = (jnp.dot(h2.astype(wh.dtype), wh, preferred_element_type=jnp.float32)
            + misc_ref[2:3, 0:2 * ACTION_DIM])            # (TB, 2*ACTION_DIM) f32

    mean_ref[...] = head[:, :ACTION_DIM]
    std_ref[...] = jnp.exp(jnp.clip(head[:, ACTION_DIM:2 * ACTION_DIM], -20.0, 2.0))


def pack_params(params, weight_dtype=jnp.bfloat16):
    """Pack small params into one resident f32 slab; fuse/cast head + w2."""
    w1, b1, w2, b2, wm, bm, wl, bl = params
    assert wm.shape == (HIDDEN, ACTION_DIM) and wl.shape == (HIDDEN, ACTION_DIM)
    assert HIDDEN >= 2 * ACTION_DIM and MISC_ROWS >= W1_ROW + STATE_DIM

    misc = jnp.zeros((MISC_ROWS, HIDDEN), jnp.float32)
    misc = misc.at[0, :].set(b1.reshape(-1).astype(jnp.float32))
    misc = misc.at[1, :].set(b2.reshape(-1).astype(jnp.float32))
    misc = misc.at[2, :2 * ACTION_DIM].set(
        jnp.concatenate([bm.reshape(-1), bl.reshape(-1)]).astype(jnp.float32))
    misc = misc.at[W1_ROW:W1_ROW + STATE_DIM, :].set(w1.astype(jnp.float32))

    wh = jnp.concatenate([wm, wl], axis=1)                # (HIDDEN, 2*ACTION_DIM)
    return misc, w2.astype(weight_dtype), wh.astype(weight_dtype)


def actor_forward(state, params, *, weight_dtype=jnp.bfloat16, batch_block=1024):
    """state: (B, STATE_DIM). Returns (mean, std), each (B, ACTION_DIM) f32."""
    state = state.astype(jnp.float32)
    B = state.shape[0]
    misc, w2, wh = pack_params(params, weight_dtype)

    # Batch tile: large (amortizes ~0.35us/grid-step overhead); for B > 64 keep
    # >= 2 blocks so dimension_semantics=("parallel",) can use both v7x TCs.
    if B > 64:
        tb = min(batch_block, _round_up(pl.cdiv(B, 2), 8))
    else:
        tb = min(batch_block, _round_up(max(B, 1), 8))
    tb = max(8, (tb // 8) * 8)

    b_pad = _round_up(B, tb)
    if b_pad != B:
        state = jnp.pad(state, ((0, b_pad - B), (0, 0)))
    grid = (b_pad // tb,)

    def resident(a):  # whole array, same block every grid step -> stays in VMEM
        return pl.BlockSpec(a.shape, lambda i: (0,) * a.ndim)

    mean_p, std_p = pl.pallas_call(
        actor_fwd_kernel,
        out_shape=(jax.ShapeDtypeStruct((b_pad, ACTION_DIM), jnp.float32),
                   jax.ShapeDtypeStruct((b_pad, ACTION_DIM), jnp.float32)),
        grid=grid,
        in_specs=[pl.BlockSpec((tb, STATE_DIM), lambda i: (i, 0)),
                  resident(misc), resident(w2), resident(wh)],
        out_specs=[pl.BlockSpec((tb, ACTION_DIM), lambda i: (i, 0)),
                   pl.BlockSpec((tb, ACTION_DIM), lambda i: (i, 0))],
        compiler_params=pltpu.CompilerParams(
            dimension_semantics=("parallel",)),  # batch blocks shard across TCs (v7x)
    )(state, misc, w2, wh)

    return mean_p[:B], std_p[:B]


def init_params(key):
    """Deterministic init mimicking nn.Linear's U(-1/sqrt(fan_in), 1/sqrt(fan_in)).
    Weights stored as (in_features, out_features) (transpose of PyTorch)."""
    def linear(k, fan_in, fan_out):
        kw, kb = jax.random.split(k)
        bound = 1.0 / jnp.sqrt(float(fan_in))
        w = jax.random.uniform(kw, (fan_in, fan_out), jnp.float32, -bound, bound)
        b = jax.random.uniform(kb, (1, fan_out), jnp.float32, -bound, bound)
        return w, b

    k1, k2, k3, k4 = jax.random.split(key, 4)
    w1, b1 = linear(k1, STATE_DIM, HIDDEN)
    w2, b2 = linear(k2, HIDDEN, HIDDEN)
    wm, bm = linear(k3, HIDDEN, ACTION_DIM)
    wl, bl = linear(k4, HIDDEN, ACTION_DIM)
    return (w1, b1, w2, b2, wm, bm, wl, bl)


def actor_forward_ref(state, params, *, weight_dtype=jnp.float32):
    """Pure-JAX reference (mirrors the optional weight cast for comparison)."""
    w1, b1, w2, b2, wm, bm, wl, bl = params
    h1 = jnp.maximum(state @ w1 + b1, 0.0)
    h2 = jnp.maximum(
        jnp.dot(h1.astype(weight_dtype), w2.astype(weight_dtype),
                preferred_element_type=jnp.float32) + b2, 0.0)
    mean = jnp.dot(h2.astype(weight_dtype), wm.astype(weight_dtype),
                   preferred_element_type=jnp.float32) + bm
    log_std = jnp.dot(h2.astype(weight_dtype), wl.astype(weight_dtype),
                      preferred_element_type=jnp.float32) + bl
    log_std = jnp.clip(log_std, -20.0, 2.0)
    return mean, jnp.exp(log_std)


if __name__ == "__main__":
    key = jax.random.PRNGKey(0)
    kp, ks = jax.random.split(key)

    params = init_params(kp)
    B = 8
    state = jax.random.uniform(ks, (B, STATE_DIM), jnp.float32, -1.0, 1.0)

    # Default path (bf16 weights, f32 accumulation) — loose check.
    mean_bf, std_bf = actor_forward(state, params)
    jax.block_until_ready((mean_bf, std_bf))
    mean_bref, std_bref = actor_forward_ref(state, params, weight_dtype=jnp.bfloat16)
    assert mean_bf.shape == (B, ACTION_DIM) and std_bf.shape == (B, ACTION_DIM)
    assert jnp.allclose(mean_bf, mean_bref, atol=5e-3, rtol=5e-2)
    assert jnp.allclose(std_bf, std_bref, atol=5e-3, rtol=5e-2)
    assert bool(jnp.all(std_bf > 0.0))

    # f32-weight path — tight check against the pure-JAX reference.
    mean, std = actor_forward(state, params, weight_dtype=jnp.float32)
    jax.block_until_ready((mean, std))
    mean_ref, std_ref = actor_forward_ref(state, params)
    assert jnp.allclose(mean, mean_ref, atol=1e-4, rtol=1e-4)
    assert jnp.allclose(std, std_ref, atol=1e-4, rtol=1e-4)
    assert bool(jnp.all(std > 0.0))

    # Non-multiple-of-block batch: exercises padding + a 2-block grid.
    B2 = 20
    state2 = jax.random.uniform(jax.random.PRNGKey(1), (B2, STATE_DIM),
                                jnp.float32, -1.0, 1.0)
    mean2, std2 = actor_forward(state2, params, weight_dtype=jnp.float32,
                                batch_block=16)
    jax.block_until_ready((mean2, std2))
    mean2_ref, std2_ref = actor_forward_ref(state2, params)
    assert mean2.shape == (B2, ACTION_DIM) and std2.shape == (B2, ACTION_DIM)
    assert jnp.allclose(mean2, mean2_ref, atol=1e-4, rtol=1e-4)
    assert jnp.allclose(std2, std2_ref, atol=1e-4, rtol=1e-4)

    # B > 64: exercises the ">= 2 blocks for v7x" tile rule + batch padding.
    B3 = 200
    state3 = jax.random.uniform(jax.random.PRNGKey(2), (B3, STATE_DIM),
                                jnp.float32, -1.0, 1.0)
    mean3, std3 = actor_forward(state3, params, weight_dtype=jnp.float32)
    jax.block_until_ready((mean3, std3))
    mean3_ref, std3_ref = actor_forward_ref(state3, params)
    assert mean3.shape == (B3, ACTION_DIM) and std3.shape == (B3, ACTION_DIM)
    assert jnp.allclose(mean3, mean3_ref, atol=1e-4, rtol=1e-4)
    assert jnp.allclose(std3, std3_ref, atol=1e-4, rtol=1e-4)

    # TODO(synk): Actor.sample() (rsample/tanh/log_prob) is host/JAX-side logic,
    # not part of forward(); only forward() is implemented as a kernel.
    print("KERNEL_OK")
</pallas_src>

<mosaic_0001>
module attributes {stable_mosaic.version = 11 : i64} {
  func.func @actor_fwd_kernel(%arg0: i32, %arg1: memref<8x4xf32, #tpu.memory_space<vmem>>, %arg2: memref<8x256xf32, #tpu.memory_space<vmem>>, %arg3: memref<256x256xbf16, #tpu.memory_space<vmem>>, %arg4: memref<256x4xbf16, #tpu.memory_space<vmem>>, %arg5: memref<8x2xf32, #tpu.memory_space<vmem>>, %arg6: memref<8x2xf32, #tpu.memory_space<vmem>>) attributes {dimension_semantics = [#tpu.dimension_semantics<parallel>], iteration_bounds = array<i64: 1>, scalar_prefetch = 0 : i64, scratch_operands = 0 : i64, tpu.core_type = #tpu.core_type<tc>, window_params = [{transform_indices = @transform_0, window_bounds = array<i64: 8, 4>}, {pipeline_mode = #tpu.pipeline_mode<synchronous>, transform_indices = @transform_1, window_bounds = array<i64: 8, 256>}, {pipeline_mode = #tpu.pipeline_mode<synchronous>, transform_indices = @transform_2, window_bounds = array<i64: 256, 256>}, {pipeline_mode = #tpu.pipeline_mode<synchronous>, transform_indices = @transform_3, window_bounds = array<i64: 256, 4>}, {transform_indices = @transform_4, window_bounds = array<i64: 8, 2>}, {transform_indices = @transform_5, window_bounds = array<i64: 8, 2>}]} {
    %c0 = arith.constant 0 : index
    %c0_0 = arith.constant 0 : index
    %0 = vector.load %arg1[%c0, %c0_0] : memref<8x4xf32, #tpu.memory_space<vmem>>, vector<8x4xf32>
    %1 = vector.extract_strided_slice %0 {offsets = [0, 0], sizes = [8, 1], strides = [1, 1]} : vector<8x4xf32> to vector<8x1xf32>
    %c4 = arith.constant 4 : index
    %c0_1 = arith.constant 0 : index
    %2 = vector.load %arg2[%c4, %c0_1] : memref<8x256xf32, #tpu.memory_space<vmem>>, vector<1x256xf32>
    %3 = vector.broadcast %1 : vector<8x1xf32> to vector<8x256xf32>
    %4 = vector.broadcast %2 : vector<1x256xf32> to vector<8x256xf32>
    %5 = arith.mulf %3, %4 : vector<8x256xf32>
    %c0_2 = arith.constant 0 : index
    %c0_3 = arith.constant 0 : index
    %6 = vector.load %arg2[%c0_2, %c0_3] : memref<8x256xf32, #tpu.memory_space<vmem>>, vector<1x256xf32>
    %7 = vector.broadcast %6 : vector<1x256xf32> to vector<8x256xf32>
    %8 = arith.addf %5, %7 : vector<8x256xf32>
    %9 = vector.extract_strided_slice %0 {offsets = [0, 1], sizes = [8, 1], strides = [1, 1]} : vector<8x4xf32> to vector<8x1xf32>
    %c5 = arith.constant 5 : index
    %c0_4 = arith.constant 0 : index
    %10 = vector.load %arg2[%c5, %c0_4] : memref<8x256xf32, #tpu.memory_space<vmem>>, vector<1x256xf32>
    %11 = vector.broadcast %9 : vector<8x1xf32> to vector<8x256xf32>
    %12 = vector.broadcast %10 : vector<1x256xf32> to vector<8x256xf32>
    %13 = arith.mulf %11, %12 : vector<8x256xf32>
    %14 = arith.addf %8, %13 : vector<8x256xf32>
    %15 = vector.extract_strided_slice %0 {offsets = [0, 2], sizes = [8, 1], strides = [1, 1]} : vector<8x4xf32> to vector<8x1xf32>
    %c6 = arith.constant 6 : index
    %c0_5 = arith.constant 0 : index
    %16 = vector.load %arg2[%c6, %c0_5] : memref<8x256xf32, #tpu.memory_space<vmem>>, vector<1x256xf32>
    %17 = vector.broadcast %15 : vector<8x1xf32> to vector<8x256xf32>
    %18 = vector.broadcast %16 : vector<1x256xf32> to vector<8x256xf32>
    %19 = arith.mulf %17, %18 : vector<8x256xf32>
    %20 = arith.addf %14, %19 : vector<8x256xf32>
    %21 = vector.extract_strided_slice %0 {offsets = [0, 3], sizes = [8, 1], strides = [1, 1]} : vector<8x4xf32> to vector<8x1xf32>
    %c7 = arith.constant 7 : index
    %c0_6 = arith.constant 0 : index
    %22 = vector.load %arg2[%c7, %c0_6] : memref<8x256xf32, #tpu.memory_space<vmem>>, vector<1x256xf32>
    %23 = vector.broadcast %21 : vector<8x1xf32> to vector<8x256xf32>
    %24 = vector.broadcast %22 : vector<1x256xf32> to vector<8x256xf32>
    %25 = arith.mulf %23, %24 : vector<8x256xf32>
    %26 = arith.addf %20, %25 : vector<8x256xf32>
    %cst = arith.constant 0.000000e+00 : f32
    %27 = vector.broadcast %cst : f32 to vector<8x256xf32>
    %28 = arith.maximumf %26, %27 : vector<8x256xf32>
    %c0_7 = arith.constant 0 : index
    %c0_8 = arith.constant 0 : index
    %29 = vector.load %arg3[%c0_7, %c0_8] : memref<256x256xbf16, #tpu.memory_space<vmem>>, vector<256x256xbf16>
    %30 = arith.truncf %28 : vector<8x256xf32> to vector<8x256xbf16>
    %cst_9 = arith.constant dense<0.000000e+00> : vector<8x256xf32>
    %31 = tpu.matmul %30, %29, %cst_9 {dimension_numbers = #tpu.dot_dimension_numbers<[1], [0], [0], [1], [0, 0, 1, 1], [], []>} : vector<8x256xbf16>, vector<256x256xbf16>, vector<8x256xf32> -> vector<8x256xf32>
    %c1 = arith.constant 1 : index
    %c0_10 = arith.constant 0 : index
    %32 = vector.load %arg2[%c1, %c0_10] : memref<8x256xf32, #tpu.memory_space<vmem>>, vector<1x256xf32>
    %33 = vector.broadcast %32 : vector<1x256xf32> to vector<8x256xf32>
    %34 = arith.addf %31, %33 : vector<8x256xf32>
    %cst_11 = arith.constant 0.000000e+00 : f32
    %35 = vector.broadcast %cst_11 : f32 to vector<8x256xf32>
    %36 = arith.maximumf %34, %35 : vector<8x256xf32>
    %c0_12 = arith.constant 0 : index
    %c0_13 = arith.constant 0 : index
    %37 = vector.load %arg4[%c0_12, %c0_13] : memref<256x4xbf16, #tpu.memory_space<vmem>>, vector<256x4xbf16>
    %38 = arith.truncf %36 : vector<8x256xf32> to vector<8x256xbf16>
    %cst_14 = arith.constant dense<0.000000e+00> : vector<8x4xf32>
    %39 = tpu.matmul %38, %37, %cst_14 {dimension_numbers = #tpu.dot_dimension_numbers<[1], [0], [0], [1], [0, 0, 1, 1], [], []>} : vector<8x256xbf16>, vector<256x4xbf16>, vector<8x4xf32> -> vector<8x4xf32>
    %c2 = arith.constant 2 : index
    %c0_15 = arith.constant 0 : index
    %40 = vector.load %arg2[%c2, %c0_15] : memref<8x256xf32, #tpu.memory_space<vmem>>, vector<1x4xf32>
    %41 = vector.broadcast %40 : vector<1x4xf32> to vector<8x4xf32>
    %42 = arith.addf %39, %41 : vector<8x4xf32>
    %43 = vector.extract_strided_slice %42 {offsets = [0, 0], sizes = [8, 2], strides = [1, 1]} : vector<8x4xf32> to vector<8x2xf32>
    %c0_16 = arith.constant 0 : index
    %c0_17 = arith.constant 0 : index
    %44 = vector.load %arg5[%c0_16, %c0_17] : memref<8x2xf32, #tpu.memory_space<vmem>>, vector<8x2xf32>
    tpu.vector_store %arg5[%c0_16, %c0_17], %43 {strides = array<i32>} : memref<8x2xf32, #tpu.memory_space<vmem>>, vector<8x2xf32>,
    %45 = vector.extract_strided_slice %42 {offsets = [0, 2], sizes = [8, 2], strides = [1, 1]} : vector<8x4xf32> to vector<8x2xf32>
    %cst_18 = arith.constant -2.000000e+01 : f32
    %cst_19 = arith.constant 2.000000e+00 : f32
    %46 = vector.broadcast %cst_18 : f32 to vector<8x2xf32>
    %47 = arith.maximumf %46, %45 : vector<8x2xf32>
    %48 = vector.broadcast %cst_19 : f32 to vector<8x2xf32>
    %49 = arith.minimumf %48, %47 : vector<8x2xf32>
    %50 = math.exp %49 : vector<8x2xf32>
    %c0_20 = arith.constant 0 : index
    %c0_21 = arith.constant 0 : index
    %51 = vector.load %arg6[%c0_20, %c0_21] : memref<8x2xf32, #tpu.memory_space<vmem>>, vector<8x2xf32>
    tpu.vector_store %arg6[%c0_20, %c0_21], %50 {strides = array<i32>} : memref<8x2xf32, #tpu.memory_space<vmem>>, vector<8x2xf32>,
    return
  }
  func.func @transform_0(%arg0: i32) -> (i32, i32) {
    %c0_i32 = arith.constant 0 : i32
    %c0_i32_0 = arith.constant 0 : i32
    return %arg0, %c0_i32 : i32, i32
  }
  func.func @transform_1(%arg0: i32) -> (i32, i32) {
    %c0_i32 = arith.constant 0 : i32
    %c0_i32_0 = arith.constant 0 : i32
    %c0_i32_1 = arith.constant 0 : i32
    return %c0_i32, %c0_i32_0 : i32, i32
  }
  func.func @transform_2(%arg0: i32) -> (i32, i32) {
    %c0_i32 = arith.constant 0 : i32
    %c0_i32_0 = arith.constant 0 : i32
    %c0_i32_1 = arith.constant 0 : i32
    return %c0_i32, %c0_i32_0 : i32, i32
  }
  func.func @transform_3(%arg0: i32) -> (i32, i32) {
    %c0_i32 = arith.constant 0 : i32
    %c0_i32_0 = arith.constant 0 : i32
    %c0_i32_1 = arith.constant 0 : i32
    return %c0_i32, %c0_i32_0 : i32, i32
  }
  func.func @transform_4(%arg0: i32) -> (i32, i32) {
    %c0_i32 = arith.constant 0 : i32
    %c0_i32_0 = arith.constant 0 : i32
    return %arg0, %c0_i32 : i32, i32
  }
  func.func @transform_5(%arg0: i32) -> (i32, i32) {
    %c0_i32 = arith.constant 0 : i32
    %c0_i32_0 = arith.constant 0 : i32
    return %arg0, %c0_i32 : i32, i32
  }
}

</mosaic_0001>

<bundles_post_ra>
// kernel: tpu_custom_call.1
= control target key start
LH: loop header
LB: loop body
LE: loop exit
PB: predicated region body
PF: predicated region fallthrough
CT: control target
= control target key end

     0   :  { %11 = vsyncpa [#allocation3], 0  ;;  %s823_s21 = smov [#allocation2]   ;;  %s824_s23 = smov 128   ;;  %s942_s0 = inlined_call_operand.vmem [shape: f32[8,4], index: 0, kind: input, shape index: {}]   ;;  %s943_s1 = inlined_call_operand.vmem [shape: f32[8,256], index: 1, kind: input, shape index: {}]   ;;  %s944_s2 = inlined_call_operand.hbm [shape: bf16[256,256], index: 2, kind: input, shape index: {}]   ;;  %s945_s3 = inlined_call_operand.vmem [shape: bf16[256,4], index: 3, kind: input, shape index: {}]   ;;  %s946_s4 = inlined_call_operand.vmem [shape: f32[8,2], index: 4, kind: output, shape index: {0}]   ;;  %s947_s5 = inlined_call_operand.vmem [shape: f32[8,2], index: 5, kind: output, shape index: {1}]  }
   0x1   :  { %s20_s20 = sshll.u32 %s944_s2, 4  ;;  %s22_s22 = sshll.u32 %s823_s21, 4  ;;  %s21_s20 = int_to_ptr.hbm [resolvable:$true] %s20_s20  ;;  %s23_s22 = int_to_ptr.vmem [resolvable:$true] %s22_s22 }
   0x2   :  { %s825_s24 = smov 8  }
   0x3   :  { %28 = dma.hbm_to_vmem [thread:$0]  %s21_s20, 4096, %s23_s22, [#allocation3], %s824_s23, %s824_s23, %s825_s24  }
   0x4   :  { %821 = dma.done.wait [#allocation3], 4096  }
   0x5   :  { %822 = vsyncadd [#allocation3], 4294963200  ;;  %v826_v0 = vmov 0   ;;  %v827_v1 = vmov 2   ;;  %v35_v2 = vld [vmem:[%s942_s0] sm:$0xff]  ;;  %v828_v37 = vmov 1  }
   0x6   :  { %790 = vset.pattern.permute.xlu0 %v826_v0  ;;  %792 = vset.pattern.permute.xlu1 %v827_v1  ;;  %v600_v3 = vld [vmem:[#allocation2 + $0x70] sm:$0xf]  ;;  %v749_v4 = vld [vmem:[#allocation2 + $0x74] sm:$0xf0]  ;;  %v748_v8 = vld [vmem:[#allocation2 + $0x74] sm:$0xf] }
   0x7   :  { %40 = vperm.xlu0 %790, %v35_v2   ;;  %76 = vperm.xlu1 %792, %v35_v2   ;;  %v601_v5 = vor.u32 %v749_v4, %v600_v3  ;;  %v664_v6 = vld [vmem:[#allocation2 + $0xf0] sm:$0xf]  ;;  %v765_v7 = vld [vmem:[#allocation2 + $0xf4] sm:$0xf0]  ;;  %v602_v10 = vld [vmem:[#allocation2 + $0x78] sm:$0xf0] }
   0x8   :  { %v665_v9 = vor.u32 %v765_v7, %v664_v6  ;;  %v764_v11 = vld [vmem:[#allocation2 + $0xf4] sm:$0xf]  ;;  %v666_v12 = vld [vmem:[#allocation2 + $0xf8] sm:$0xf0]  ;;  %v605_v13 = vor.u32 %v748_v8, %v602_v10  ;;  %v592_v15 = vld [vmem:[#allocation2 + $0x60] sm:$0xf] }
   0x9   :  { %306 = vmatpush.bf16.msra.mxu0 %v601_v5  ;;  %v669_v14 = vor.u32 %v764_v11, %v666_v12  ;;  %v747_v16 = vld [vmem:[#allocation2 + $0x64] sm:$0xf0]  ;;  %v656_v17 = vld [vmem:[#allocation2 + $0xe0] sm:$0xf]  ;;  %v746_v20 = vld [vmem:[#allocation2 + $0x64] sm:$0xf] }
   0xa   :  { %319 = vmatpush.bf16.msra.mxu1 %v665_v9  ;;  %v593_v18 = vor.u32 %v747_v16, %v592_v15  ;;  %v763_v19 = vld [vmem:[#allocation2 + $0xe4] sm:$0xf0]  ;;  %v594_v21 = vld [vmem:[#allocation2 + $0x68] sm:$0xf0]  ;;  %332 = vmatpush.bf16.msra.mxu2 %v605_v13  ;;  %v762_v23 = vld [vmem:[#allocation2 + $0xe4] sm:$0xf] }
   0xb   :  { %345 = vmatpush.bf16.msra.mxu3 %v669_v14  ;;  %v657_v22 = vor.u32 %v763_v19, %v656_v17  ;;  %v658_v24 = vld [vmem:[#allocation2 + $0xe8] sm:$0xf0]  ;;  %v584_v25 = vld [vmem:[#allocation2 + $0x50] sm:$0xf]  ;;  %v745_v26 = vld [vmem:[#allocation2 + $0x54] sm:$0xf0]  ;;  %v597_v29 = vor.u32 %v746_v20, %v594_v21 }
   0xc   :  { %v648_v27 = vld [vmem:[#allocation2 + $0xd0] sm:$0xf]  ;;  %v761_v28 = vld [vmem:[#allocation2 + $0xd4] sm:$0xf0]  ;;  %v661_v30 = vor.u32 %v762_v23, %v658_v24  ;;  %v744_v31 = vld [vmem:[#allocation2 + $0x54] sm:$0xf]  ;;  %v585_v32 = vor.u32 %v745_v26, %v584_v25 }
   0xd   :  { %307 = vmatpush.bf16.msra.mxu0 %v593_v18  ;;  %v649_v33 = vor.u32 %v761_v28, %v648_v27  ;;  %v586_v34 = vld [vmem:[#allocation2 + $0x58] sm:$0xf0]  ;;  %v760_v35 = vld [vmem:[#allocation2 + $0xd4] sm:$0xf]  ;;  %v829_v38 = vmov 3   ;;  %vm517_vm0 = vcmask 15360  }
   0xe   :  { %320 = vmatpush.bf16.msra.mxu1 %v657_v22  ;;  %v650_v36 = vld [vmem:[#allocation2 + $0xd8] sm:$0xf0]  ;;  %333 = vmatpush.bf16.msra.mxu2 %v597_v29  ;;  %v589_v39 = vor.u32 %v744_v31, %v586_v34  ;;  %v576_v41 = vld [vmem:[#allocation2 + $0x40] sm:$0xf]  ;;  %v743_v42 = vld [vmem:[#allocation2 + $0x44] sm:$0xf0] }
   0xf   :  { %791 = vset.pattern.permute.xlu0 %v828_v37  ;;  %793 = vset.pattern.permute.xlu1 %v829_v38  ;;  %v653_v40 = vor.u32 %v760_v35, %v650_v36  ;;  %v640_v43 = vld [vmem:[#allocation2 + $0xc0] sm:$0xf]  ;;  %v577_v44 = vor.u32 %v743_v42, %v576_v41  ;;  %v759_v45 = vld [vmem:[#allocation2 + $0xc4] sm:$0xf0]  ;;  %v742_v46 = vld [vmem:[#allocation2 + $0x44] sm:$0xf] }
  0x10   :  { %61 = vperm.xlu0 %791, %v35_v2   ;;  %91 = vperm.xlu1 %793, %v35_v2   ;;  %v578_v47 = vld [vmem:[#allocation2 + $0x48] sm:$0xf0]  ;;  %v641_v48 = vor.u32 %v759_v45, %v640_v43  ;;  %v758_v50 = vld [vmem:[#allocation2 + $0xc4] sm:$0xf]  ;;  %v568_v53 = vld [vmem:[#allocation2 + $0x30] sm:$0xf] }
  0x11   :  { %346 = vmatpush.bf16.msra.mxu3 %v661_v30  ;;  %308 = vmatpush.bf16.msra.mxu0 %v585_v32  ;;  %v581_v49 = vor.u32 %v742_v46, %v578_v47  ;;  %v642_v51 = vld [vmem:[#allocation2 + $0xc8] sm:$0xf0]  ;;  %v741_v54 = vld [vmem:[#allocation2 + $0x34] sm:$0xf0]  ;;  %v632_v55 = vld [vmem:[#allocation2 + $0xb0] sm:$0xf] }
  0x12   :  { %321 = vmatpush.bf16.msra.mxu1 %v649_v33  ;;  %334 = vmatpush.bf16.msra.mxu2 %v589_v39  ;;  %v645_v52 = vor.u32 %v758_v50, %v642_v51  ;;  %v569_v56 = vor.u32 %v741_v54, %v568_v53  ;;  %v757_v57 = vld [vmem:[#allocation2 + $0xb4] sm:$0xf0]  ;;  %v740_v58 = vld [vmem:[#allocation2 + $0x34] sm:$0xf]  ;;  %v570_v59 = vld [vmem:[#allocation2 + $0x38] sm:$0xf0] }
  0x13   :  { %v633_v60 = vor.u32 %v757_v57, %v632_v55  ;;  %v573_v61 = vor.u32 %v740_v58, %v570_v59  ;;  %v756_v62 = vld [vmem:[#allocation2 + $0xb4] sm:$0xf]  ;;  %v634_v63 = vld [vmem:[#allocation2 + $0xb8] sm:$0xf0]  ;;  %v560_v1 = vld [vmem:[#allocation2 + $0x20] sm:$0xf] }
  0x14   :  { %v637_v0 = vor.u32 %v756_v62, %v634_v63  ;;  %v739_v2 = vld [vmem:[#allocation2 + $0x24] sm:$0xf0]  ;;  %v624_v4 = vld [vmem:[#allocation2 + $0xa0] sm:$0xf]  ;;  %v738_v6 = vld [vmem:[#allocation2 + $0x24] sm:$0xf] }
  0x15   :  { %347 = vmatpush.bf16.msra.mxu3 %v653_v40  ;;  %309 = vmatpush.bf16.msra.mxu0 %v577_v44  ;;  %v561_v3 = vor.u32 %v739_v2, %v560_v1  ;;  %v755_v5 = vld [vmem:[#allocation2 + $0xa4] sm:$0xf0]  ;;  %v562_v8 = vld [vmem:[#allocation2 + $0x28] sm:$0xf0]  ;;  %v754_v9 = vld [vmem:[#allocation2 + $0xa4] sm:$0xf] }
  0x16   :  { %322 = vmatpush.bf16.msra.mxu1 %v641_v48  ;;  %335 = vmatpush.bf16.msra.mxu2 %v581_v49  ;;  %v625_v7 = vor.u32 %v755_v5, %v624_v4  ;;  %v626_v10 = vld [vmem:[#allocation2 + $0xa8] sm:$0xf0]  ;;  %v565_v11 = vor.u32 %v738_v6, %v562_v8  ;;  %v552_v13 = vld [vmem:[#allocation2 + $0x10] sm:$0xf]  ;;  %v737_v14 = vld [vmem:[#allocation2 + $0x14] sm:$0xf0] }
  0x17   :  { %v629_v12 = vor.u32 %v754_v9, %v626_v10  ;;  %v553_v15 = vor.u32 %v737_v14, %v552_v13  ;;  %v616_v16 = vld [vmem:[#allocation2 + $0x90] sm:$0xf]  ;;  %v753_v17 = vld [vmem:[#allocation2 + $0x94] sm:$0xf0]  ;;  %v736_v18 = vld [vmem:[#allocation2 + $0x14] sm:$0xf] }
  0x18   :  { %794 = vset.pattern.permute.xlu0 %v829_v38  ;;  %v617_v19 = vor.u32 %v753_v17, %v616_v16  ;;  %v554_v20 = vld [vmem:[#allocation2 + $0x18] sm:$0xf0]  ;;  %v752_v21 = vld [vmem:[#allocation2 + $0x94] sm:$0xf]  ;;  %v544_v25 = vld [vmem:[#allocation2] sm:$0xf] }
  0x19   :  { %348 = vmatpush.bf16.msra.mxu3 %v645_v52  ;;  %310 = vmatpush.bf16.msra.mxu0 %v569_v56  ;;  %v618_v22 = vld [vmem:[#allocation2 + $0x98] sm:$0xf0]  ;;  %v557_v23 = vor.u32 %v736_v18, %v554_v20  ;;  %v735_v26 = vld [vmem:[#allocation2 + $0x4] sm:$0xf0]  ;;  %v608_v27 = vld [vmem:[#allocation2 + $0x80] sm:$0xf] }
  0x1a   :  { %323 = vmatpush.bf16.msra.mxu1 %v633_v60  ;;  %336 = vmatpush.bf16.msra.mxu2 %v573_v61  ;;  %v621_v24 = vor.u32 %v752_v21, %v618_v22  ;;  %v545_v28 = vor.u32 %v735_v26, %v544_v25  ;;  %v751_v29 = vld [vmem:[#allocation2 + $0x84] sm:$0xf0]  ;;  %v734_v30 = vld [vmem:[#allocation2 + $0x4] sm:$0xf]  ;;  %v546_v31 = vld [vmem:[#allocation2 + $0x8] sm:$0xf0] }
  0x1b   :  { %v609_v32 = vor.u32 %v751_v29, %v608_v27  ;;  %v549_v33 = vor.u32 %v734_v30, %v546_v31  ;;  %v750_v34 = vld [vmem:[#allocation2 + $0x84] sm:$0xf]  ;;  %v610_v35 = vld [vmem:[#allocation2 + $0x88] sm:$0xf0]  ;;  %v773_v37 = vld [vmem:[%s945_s3 + $0x38] sm:$0xff]  ;;  %s830_s20 = smov 126  }
  0x1c   :  { %v613_v36 = vor.u32 %v750_v34, %v610_v35  ;;  %v781_v38 = vld [vmem:[%s945_s3 + $0x78] sm:$0xff]  ;;  %v772_v39 = vld [vmem:[%s945_s3 + $0x30] sm:$0xff]  ;;  %v771_v41 = vld [vmem:[%s945_s3 + $0x28] sm:$0xff] }
  0x1d   :  { %349 = vmatpush.bf16.msra.mxu3 %v637_v0  ;;  %311 = vmatpush.bf16.msra.mxu0 %v561_v3  ;;  %v780_v40 = vld [vmem:[%s945_s3 + $0x70] sm:$0xff]  ;;  %v779_v42 = vld [vmem:[%s945_s3 + $0x68] sm:$0xff]  ;;  %v770_v46 = vld [vmem:[%s945_s3 + $0x20] sm:$0xff] }
  0x1e   :  { %324 = vmatpush.bf16.msra.mxu1 %v625_v7  ;;  %337 = vmatpush.bf16.msra.mxu2 %v565_v11  ;;  %v537_v43 = vld [vmem:[%s943_s1 + $0x4] ss:$8 sm:$0x3]  ;;  %v50_v49 = vld [vmem:[%s943_s1] ss:$8 sm:$0x3] }
  0x1f   :  { %v44_v47 = vperm.slane %v537_v43, 0  ;;  %v45_v48 = vperm.slane %v537_v43, 1  ;;  %v778_v50 = vld [vmem:[%s945_s3 + $0x60] sm:$0xff]  ;;  %v52_v53 = vperm.slane %v50_v49, 0  ;;  %v53_v54 = vperm.slane %v50_v49, 1  ;;  %v769_v56 = vld [vmem:[%s945_s3 + $0x18] sm:$0xff] }
  0x20   :  { %v538_v51 = vld [vmem:[%s943_s1 + $0x5] ss:$8 sm:$0x3]  ;;  %v539_v52 = vld [vmem:[%s943_s1 + $0x6] ss:$8 sm:$0x3] }
  0x21   :  { %350 = vmatpush.bf16.msra.mxu3 %v629_v12  ;;  %312 = vmatpush.bf16.msra.mxu0 %v553_v15  ;;  %v540_v55 = vld [vmem:[%s943_s1 + $0x7] ss:$8 sm:$0x3]  ;;  %v65_v59 = vperm.slane %v538_v51, 0  ;;  %v66_v60 = vperm.slane %v538_v51, 1  ;;  %v80_v61 = vperm.slane %v539_v52, 0 }
  0x22   :  { %325 = vmatpush.bf16.msra.mxu1 %v617_v19  ;;  %338 = vmatpush.bf16.msra.mxu2 %v557_v23  ;;  %v81_v62 = vperm.slane %v539_v52, 1  ;;  %v95_v63 = vperm.slane %v540_v55, 0  ;;  %v96_v0 = vperm.slane %v540_v55, 1  ;;  %v768_v3 = vld [vmem:[%s945_s3 + $0x10] sm:$0xff]  ;;  %v777_v22 = vld [vmem:[%s945_s3 + $0x58] sm:$0xff]  ;;  %v767_v23 = vld [vmem:[%s945_s3 + $0x8] sm:$0xff] }
  0x23   :  { %v766_v25 = vld [vmem:[%s945_s3] sm:$0xff]  ;;  %v775_v26 = vld [vmem:[%s945_s3 + $0x48] sm:$0xff] }
  0x24   :  { %v774_v27 = vld [vmem:[%s945_s3 + $0x40] sm:$0xff] }
  0x25   :  { %351 = vmatpush.bf16.msra.mxu3 %v621_v24  ;;  %313 = vmatpush.bf16.msra.mxu0 %v545_v28  ;;  %v776_v24 = vld [vmem:[%s945_s3 + $0x50] sm:$0xff]  ;;  %v541_v28 = vld [vmem:[%s943_s1 + $0x1] ss:$8 sm:$0x3] }
  0x26   :  { %326 = vmatpush.bf16.msra.mxu1 %v609_v32  ;;  %339 = vmatpush.bf16.msra.mxu2 %v549_v33  ;;  %v142_v29 = vperm.slane %v541_v28, 0  ;;  %v143_v34 = vperm.slane %v541_v28, 1 }
  0x29   :  { %352 = vmatpush.bf16.msra.mxu3 %v613_v36  ;;  %491 = vmatpush.bf16.msrb.mxu0 %v773_v37 }
  0x2a   :  { %504 = vmatpush.bf16.msrb.mxu1 %v781_v38 }
  0x2d   :  { %492 = vmatpush.bf16.msrb.mxu0 %v772_v39 }
  0x2e   :  { %505 = vmatpush.bf16.msrb.mxu1 %v780_v40 }
  0x31   :  { %493 = vmatpush.bf16.msrb.mxu0 %v771_v41 }
  0x32   :  { %506 = vmatpush.bf16.msrb.mxu1 %v779_v42 }
  0x35   :  { %494 = vmatpush.bf16.msrb.mxu0 %v770_v46 }
  0x36   :  { %507 = vmatpush.bf16.msrb.mxu1 %v778_v50 }
  0x39   :  { %495 = vmatpush.bf16.msrb.mxu0 %v769_v56 }
  0x3a   :  { %508 = vmatpush.bf16.msrb.mxu1 %v777_v22 }
  0x3d   :  { %496 = vmatpush.bf16.msrb.mxu0 %v768_v3 }
  0x3e   :  { %509 = vmatpush.bf16.msrb.mxu1 %v776_v24 }
  0x41   :  { %497 = vmatpush.bf16.msrb.mxu0 %v767_v23 }
  0x42   :  { %510 = vmatpush.bf16.msrb.mxu1 %v775_v26 }
  0x45   :  { %498 = vmatpush.bf16.msrb.mxu0 %v766_v25 }
  0x46   :  { %511 = vmatpush.bf16.msrb.mxu1 %v774_v27 }
  0x79   :  { %v41_v44 = vpop.permute.xlu0 %40  ;;  %v77_v45 = vpop.permute.xlu1 %76 }
  0x7a   :  { %v48_v57 = vmul.f32 %v44_v47, %v41_v44  ;;  %v49_v58 = vmul.f32 %v45_v48, %v41_v44  ;;  %v84_v8 = vmul.f32 %v80_v61, %v77_v45  ;;  %v85_v9 = vmul.f32 %v81_v62, %v77_v45  ;;  %v394_v48 = vld [vmem:[%s943_s1 + $0x2] ss:$0 sm:$0xff] }
  0x7c   :  { %v56_v4 = vadd.f32 %v52_v53, %v48_v57  ;;  %v57_v5 = vadd.f32 %v53_v54, %v49_v58 }
  0x82   :  { %v62_v1 = vpop.permute.xlu0 %61  ;;  %v92_v2 = vpop.permute.xlu1 %91 }
  0x83   :  { %v69_v6 = vmul.f32 %v65_v59, %v62_v1  ;;  %v70_v7 = vmul.f32 %v66_v60, %v62_v1  ;;  %v99_v12 = vmul.f32 %v95_v63, %v92_v2  ;;  %v100_v13 = vmul.f32 %v96_v0, %v92_v2 }
  0x85   :  { %v71_v10 = vadd.f32 %v69_v6, %v56_v4  ;;  %v72_v11 = vadd.f32 %v70_v7, %v57_v5 }
  0x87   :  { %v86_v14 = vadd.f32 %v84_v8, %v71_v10  ;;  %v87_v15 = vadd.f32 %v85_v9, %v72_v11 }
  0x89   :  { %v101_v16 = vadd.f32 %v99_v12, %v86_v14  ;;  %v102_v17 = vadd.f32 %v100_v13, %v87_v15 }
  0x8b   :  { %v103_v18 = vmax.f32 %v101_v16, 0.0  ;;  %v104_v19 = vmax.f32 %v102_v17, 0.0 }
  0x8d   :  { %v137_v20 = vpack.c.bf16 %v103_v18, %v103_v18  ;;  %v138_v21 = vpack.c.bf16 %v104_v19, %v104_v19 }
  0x8f   :  { %314 = vmatmul.bf16.vlgmr.msra.gmra.mxu0 %v137_v20  ;;  %327 = vmatmul.bf16.vlgmr.msra.gmra.mxu1 %v138_v21 }
  0x90   :  { %340 = vmatmul.bf16.vlgmr.msra.gmra.mxu2 %v137_v20  ;;  %353 = vmatmul.bf16.vlgmr.msra.gmra.mxu3 %v138_v21 }
 0x10c   :  { %v315_v30 = vpop.f32.mrf.mxu0  ;;  %v328_v31 = vpop.f32.mrf.mxu1 }
 0x10d   :  { %v316_v32 = vadd.f32 %v315_v30, %v142_v29 }
 0x10f   :  { %v329_v33 = vadd.f32 %v328_v31, %v316_v32 }
 0x111   :  { %v358_v35 = vmax.f32 %v329_v33, 0.0 }
 0x113   :  { %v392_v36 = vpack.c.bf16 %v358_v35, %v358_v35  ;;  %v341_v37 = vpop.f32.mrf.mxu2  ;;  %v354_v38 = vpop.f32.mrf.mxu3 }
 0x114   :  { %v342_v39 = vadd.f32 %v341_v37, %v143_v34  ;;  %v317_v40 = vpop.f32.mrf.mxu0  ;;  %v330_v41 = vpop.f32.mrf.mxu1 }
 0x115   :  { %499 = vmatmul.bf16.vlgmr.msrb.gmra.mxu0 %v392_v36 }
 0x116   :  { %v355_v42 = vadd.f32 %v354_v38, %v342_v39 }
 0x118   :  { %v359_v43 = vmax.f32 %v355_v42, 0.0 }
 0x11a   :  { %v393_v44 = vpack.c.bf16 %v359_v43, %v359_v43 }
 0x11b   :  { %v343_v45 = vpop.f32.mrf.mxu2  ;;  %v356_v46 = vpop.f32.mrf.mxu3 }
 0x11c   :  { %512 = vmatmul.bf16.vlgmr.msrb.gmra.mxu1 %v393_v44 }
 0x192   :  { %v500_v47 = vpop.f32.mrf.mxu0 }
 0x193   :  { %v501_v49 = vadd.f32 %v500_v47, %v394_v48 }
 0x199   :  { %v513_v50 = vpop.f32.mrf.mxu1 }
 0x19a   :  { %v514_v51 = vadd.f32 %v513_v50, %v501_v49  ;;  %v502_v52 = vpop.f32.mrf.mxu0 }
 0x19c   :  { %v519_v53 = vmax.f32 %v514_v51, -20.0  ;;  %518 = vst.msk [vmem:[%s946_s4] sm:$0xff] %vm517_vm0, %v514_v51 }
 0x19e   :  { %v520_v54 = vmin.f32 %v519_v53, 2.0 }
 0x1a0   :  { %v521_v55 = vmul.f32 1.442695, %v520_v54 }
 0x1a1   :  { %v515_v56 = vpop.f32.mrf.mxu1 }
 0x1a2   :  { %795 = vpow2.f32 %v521_v55 }
 0x1a8   :  { %v796_v57 = vpop.eup %795 }
 0x1a9   :  { %524 = vrot.lane.b32.xlu2 %v796_v57, %s830_s20 }
 0x203   :  { %v525_v58 = vpop.permute.xlu2 %524 }
 0x204   :  { %527 = vst.msk [vmem:[%s947_s5] sm:$0xff] %vm517_vm0, %v525_v58 }
 0x205   :  { %536 = vsyncpa [#allocation3], 1 }

</bundles_post_ra>
